<compile_context>
chip_gen: v6e
topology: v6e:2x2x1
jax: 0.10.0
libtpu: 0.0.40
codegen_flags: <defaults>
</compile_context>

<pallas_src>
import re
import numpy as np
import jax
import jax.numpy as jnp
from jax.experimental import pallas as pl
from jax.experimental.pallas import tpu as pltpu

TB = 8     # objects per grid step (sublane-aligned output tile)
TK = 128   # vocab rows per reduction step (lane-aligned)


def glove_pool_kernel(w_ref, vec_ref, out_ref):
    """out[b, :] = sum_v w[b, v] * table[v, :], tiled over the vocab axis."""
    k = pl.program_id(1)

    @pl.when(k == 0)
    def _():
        out_ref[...] = jnp.zeros_like(out_ref)

    out_ref[...] += jnp.dot(
        w_ref[...], vec_ref[...],
        preferred_element_type=jnp.float32,
        precision=jax.lax.Precision.HIGHEST,   # keep f32 accuracy on the MXU
    )


def glove_pooled_embed(weights, table):
    """weights: [Bp, Vp] mean-pool weights, table: [Vp, D]  ->  [Bp, D]."""
    Bp, Vp = weights.shape
    _, D = table.shape
    assert Bp % TB == 0 and Vp % TK == 0 and D % 128 == 0
    return pl.pallas_call(
        glove_pool_kernel,
        out_shape=jax.ShapeDtypeStruct((Bp, D), jnp.float32),
        grid_spec=pltpu.PrefetchScalarGridSpec(
            num_scalar_prefetch=0,
            grid=(Bp // TB, Vp // TK),
            in_specs=[
                pl.BlockSpec((TB, TK), lambda i, k: (i, k)),   # weight tile
                pl.BlockSpec((TK, D), lambda i, k: (k, 0)),    # table tile
            ],
            out_specs=pl.BlockSpec((TB, D), lambda i, k: (i, 0)),
        ),
        compiler_params=pltpu.CompilerParams(
            dimension_semantics=("parallel", "arbitrary")),
    )(weights, table)


def _round_up(x, m):
    return (x + m - 1) // m * m


def glove_forward(x, vocab, vectors, key=None):
    """Mirrors GloVeEmbedding.forward: str or list[str] -> [num_objs, D]."""
    if key is None:
        key = jax.random.PRNGKey(1234)
    objs = [x] if isinstance(x, str) else list(x)
    tokenized = [re.split(" |-", o) for o in objs]
    B = len(objs)
    V, D = vectors.shape

    # Host-side tokenization / vocab lookup (string handling has no Pallas
    # equivalent).  Each OOV occurrence gets its own appended random row,
    # matching torch.rand_like drawing a fresh vector per occurrence.
    occ = []          # (object index, table row id) per word occurrence
    n_oov = 0
    for i, toks in enumerate(tokenized):
        for w in toks:
            wid = vocab.get(w.lower())
            if wid is None:
                occ.append((i, V + n_oov))
                n_oov += 1
            else:
                occ.append((i, wid))

    V_ext = V + n_oov
    Bp = _round_up(max(B, 1), TB)
    Vp = _round_up(max(V_ext, 1), TK)

    # Mean-pool weight matrix: W[i, row] += 1 / len(words_i).
    weights = np.zeros((Bp, Vp), dtype=np.float32)
    inv_len = [1.0 / len(t) for t in tokenized]
    for i, rid in occ:
        weights[i, rid] += inv_len[i]

    # Extended, padded table: GloVe rows + OOV random rows + zero padding.
    table = vectors.astype(jnp.float32)
    if n_oov > 0:
        oov_rows = jax.random.uniform(key, (n_oov, D), dtype=jnp.float32,
                                      minval=-0.04, maxval=0.04)
        table = jnp.concatenate([table, oov_rows], axis=0)
    if Vp > V_ext:
        table = jnp.concatenate(
            [table, jnp.zeros((Vp - V_ext, D), jnp.float32)], axis=0)

    out = glove_pooled_embed(jnp.asarray(weights), table)
    return out[:B]


if __name__ == "__main__":
    # Deterministic synthetic GloVe table: vocab of 64 words, 128-dim vectors.
    V, D = 64, 128
    k_tab, k_oov = jax.random.split(jax.random.PRNGKey(0))
    vectors = jax.random.normal(k_tab, (V, D), dtype=jnp.float32)
    vocab = {f"word{i}": i for i in range(V)}

    objs = ["word1 word2", "word3-word7 zzzunknown", "word0"]
    out = jax.block_until_ready(glove_forward(objs, vocab, vectors, key=k_oov))
    assert out.shape == (3, D) and out.dtype == jnp.float32

    # Reference checks.
    ref0 = (vectors[1] + vectors[2]) / 2.0
    ref2 = vectors[0]
    assert jnp.allclose(out[0], ref0, atol=1e-4)
    assert jnp.allclose(out[2], ref2, atol=1e-4)

    # Object 1 contains one OOV word; its random row is reproducible from k_oov.
    oov_row = jax.random.uniform(k_oov, (1, D), dtype=jnp.float32,
                                 minval=-0.04, maxval=0.04)[0]
    ref1 = (vectors[3] + vectors[7] + oov_row) / 3.0
    assert jnp.allclose(out[1], ref1, atol=1e-4)

    # Single-string path (forward with str returns a stacked [1, D] tensor).
    out_single = jax.block_until_ready(
        glove_forward("word5 word6", vocab, vectors, key=k_oov))
    assert out_single.shape == (1, D)
    assert jnp.allclose(out_single[0], (vectors[5] + vectors[6]) / 2.0, atol=1e-4)

    print("KERNEL_OK")
</pallas_src>

<mosaic_0001>
module attributes {stable_mosaic.version = 11 : i64} {
  func.func @glove_pool_kernel(%arg0: i32, %arg1: i32, %arg2: memref<8x128xf32, #tpu.memory_space<vmem>>, %arg3: memref<128x128xf32, #tpu.memory_space<vmem>>, %arg4: memref<8x128xf32, #tpu.memory_space<vmem>>) attributes {dimension_semantics = [#tpu.dimension_semantics<parallel>, #tpu.dimension_semantics<arbitrary>], iteration_bounds = array<i64: 1, 1>, scalar_prefetch = 0 : i64, scratch_operands = 0 : i64, tpu.core_type = #tpu.core_type<tc>, window_params = [{transform_indices = @transform_0, window_bounds = array<i64: 8, 128>}, {transform_indices = @transform_1, window_bounds = array<i64: 128, 128>}, {transform_indices = @transform_2, window_bounds = array<i64: 8, 128>}]} {
    %c0_i32 = arith.constant 0 : i32
    %0 = arith.cmpi eq, %arg1, %c0_i32 : i32
    %1 = arith.extui %0 : i1 to i32
    %c0_i32_0 = arith.constant 0 : i32
    %2 = arith.cmpi ne, %1, %c0_i32_0 : i32
    scf.if %2 {
      %cst_8 = arith.constant 0.000000e+00 : f32
      %9 = vector.broadcast %cst_8 : f32 to vector<8x128xf32>
      %c0_9 = arith.constant 0 : index
      %c0_10 = arith.constant 0 : index
      %10 = vector.load %arg4[%c0_9, %c0_10] : memref<8x128xf32, #tpu.memory_space<vmem>>, vector<8x128xf32>
      tpu.vector_store %arg4[%c0_9, %c0_10], %9 {strides = array<i32>} : memref<8x128xf32, #tpu.memory_space<vmem>>, vector<8x128xf32>,
    } else {
    }
    %c0 = arith.constant 0 : index
    %c0_1 = arith.constant 0 : index
    %3 = vector.load %arg4[%c0, %c0_1] : memref<8x128xf32, #tpu.memory_space<vmem>>, vector<8x128xf32>
    %c0_2 = arith.constant 0 : index
    %c0_3 = arith.constant 0 : index
    %4 = vector.load %arg2[%c0_2, %c0_3] : memref<8x128xf32, #tpu.memory_space<vmem>>, vector<8x128xf32>
    %c0_4 = arith.constant 0 : index
    %c0_5 = arith.constant 0 : index
    %5 = vector.load %arg3[%c0_4, %c0_5] : memref<128x128xf32, #tpu.memory_space<vmem>>, vector<128x128xf32>
    %cst = arith.constant dense<0.000000e+00> : vector<8x128xf32>
    %6 = tpu.matmul %4, %5, %cst {dimension_numbers = #tpu.dot_dimension_numbers<[1], [0], [0], [1], [0, 0, 1, 1], [], []>, precision = #tpu.contract_precision<fp32>} : vector<8x128xf32>, vector<128x128xf32>, vector<8x128xf32> -> vector<8x128xf32>
    %7 = arith.addf %3, %6 : vector<8x128xf32>
    %c0_6 = arith.constant 0 : index
    %c0_7 = arith.constant 0 : index
    %8 = vector.load %arg4[%c0_6, %c0_7] : memref<8x128xf32, #tpu.memory_space<vmem>>, vector<8x128xf32>
    tpu.vector_store %arg4[%c0_6, %c0_7], %7 {strides = array<i32>} : memref<8x128xf32, #tpu.memory_space<vmem>>, vector<8x128xf32>,
    return
  }
  func.func @transform_0(%arg0: i32, %arg1: i32) -> (i32, i32) {
    %c0_i32 = arith.constant 0 : i32
    return %arg0, %arg1 : i32, i32
  }
  func.func @transform_1(%arg0: i32, %arg1: i32) -> (i32, i32) {
    %c0_i32 = arith.constant 0 : i32
    %c0_i32_0 = arith.constant 0 : i32
    return %arg1, %c0_i32 : i32, i32
  }
  func.func @transform_2(%arg0: i32, %arg1: i32) -> (i32, i32) {
    %c0_i32 = arith.constant 0 : i32
    %c0_i32_0 = arith.constant 0 : i32
    return %arg0, %c0_i32 : i32, i32
  }
}

</mosaic_0001>

<bundles_post_ra>
// kernel: tpu_custom_call.1
= control target key start
LH: loop header
LB: loop body
LE: loop exit
PB: predicated region body
PF: predicated region fallthrough
CT: control target
= control target key end

     0   :  { %7 = vsyncpa [#allocation3], 0  ;;  %s1499_s0 = inlined_call_operand.hbm [shape: f32[8,128], index: 0, kind: input, shape index: {}]   ;;  %s1500_s1 = inlined_call_operand.hbm [shape: f32[128,128], index: 1, kind: input, shape index: {}]   ;;  %s1501_s2 = inlined_call_operand.hbm [shape: f32[8,128], index: 2, kind: output, shape index: {}]  }
   0x1   :  { %8 = vsyncpa [#allocation6], 0 }
   0x2   :  { %9 = vsyncpa [#allocation4], 0  ;;  %s1105_s9 = smov [#allocation2]   ;;  %s1106_s11 = smov [#allocation5]  }
   0x3   :  { %s16_s10 = sshll.u32 %s1105_s9, 4  ;;  %s25_s12 = sshll.u32 %s1106_s11, 4  ;;  %s17_s10 = int_to_ptr.vmem [resolvable:$true] %s16_s10  ;;  %s26_s12 = int_to_ptr.vmem [resolvable:$true] %s25_s12 }
   0x4   :  { %s1047_s13 = scalar_lea.vmem %s17_s10, 128  ;;  %p1052_p1 = scmp.lt.s32.totalorder %s17_s10, %s17_s10 }
   0x5   :  { %p1048_p0 = scmp.ne.s32.totalorder %s17_s10, %s1047_s13  ;;  %p1053_p2 = scmp.lt.s32.totalorder %s1047_s13, %s1047_s13 }
   0x7   :  { %p1054_p3 = por %p1053_p2, %p1052_p1 }
   0x9   :  { %p1055_p4 = pnand %p1054_p3, %p1048_p0 }
   0xb   :  { %1058 = shalt.err (!%p1055_p4)
}
   0xc   :  { %19 = dma.hbm_to_vmem [thread:$0]  %s1499_s0, 128, %s17_s10, [#allocation3]  }
   0xd   :  { %s1067_s16 = scalar_lea.vmem %s26_s12, 2048  ;;  %p1072_p6 = scmp.lt.s32.totalorder %s26_s12, %s26_s12 }
   0xe   :  { %p1068_p5 = scmp.ne.s32.totalorder %s26_s12, %s1067_s16  ;;  %p1073_p7 = scmp.lt.s32.totalorder %s1067_s16, %s1067_s16 }
  0x10   :  { %p1074_p8 = por %p1073_p7, %p1072_p6 }
  0x12   :  { %p1075_p9 = pnand %p1074_p8, %p1068_p5 }
  0x14   :  { %1078 = shalt.err (!%p1075_p9)
}
  0x15   :  { %s1107_s17 = smov 128   ;;  %s1108_s18 = smov 8  }
  0x16   :  { %31 = dma.hbm_to_vmem [thread:$0]  %s1500_s1, 2048, %s26_s12, [#allocation6], %s1107_s17, %s1107_s17, %s1108_s18  }
  0x17   :  { %1099 = dma.done.wait [#allocation3], 128  }
  0x18   :  { %1100 = vsyncadd [#allocation3], 4294967168 }
  0x19   :  { %1101 = dma.done.wait [#allocation6], 2048  }
  0x1a   :  { %1102 = vsyncadd [#allocation6], 4294965248  ;;  %v1109_v0 = vmov 0.0   ;;  %vm1110_vm0 = vmmov 0   ;;  %v60_v1 = vld [vmem:[#allocation5 + $0x78] sm:$0xff]  ;;  %v59_v2 = vld [vmem:[#allocation5 + $0x70] sm:$0xff] }
  0x1b   :  { %822 = vmatprep.subr.mxu0 %v1109_v0  ;;  %857 = vmatprep.subr.mxu1 %v1109_v0  ;;  %v58_v3 = vld [vmem:[#allocation5 + $0x68] sm:$0xff]  ;;  %v1139_v4 = vand.u32 4294901760, %v60_v1  ;;  %v1141_v5 = vand.u32 4294901760, %v59_v2  ;;  %v57_v7 = vld [vmem:[#allocation5 + $0x60] sm:$0xff]  ;;  %v56_v8 = vld [vmem:[#allocation5 + $0x58] sm:$0xff]  ;;  %s1111_s0 = smov [#allocation7]  }
  0x1c   :  { %854 = vmatprep.mubr.msk.f32.mxu0 %vm1110_vm0, %v1109_v0  ;;  %889 = vmatprep.mubr.msk.f32.mxu1 %vm1110_vm0, %v1109_v0  ;;  %v1143_v6 = vand.u32 4294901760, %v58_v3  ;;  %v55_v9 = vld [vmem:[#allocation5 + $0x50] sm:$0xff]  ;;  %v1145_v10 = vand.u32 4294901760, %v57_v7  ;;  %v1147_v11 = vand.u32 4294901760, %v56_v8  ;;  %v54_v13 = vld [vmem:[#allocation5 + $0x48] sm:$0xff]  ;;  %v53_v14 = vld [vmem:[#allocation5 + $0x40] sm:$0xff] }
  0x1d   :  { %v1149_v12 = vand.u32 4294901760, %v55_v9  ;;  %823 = vmatpush3.msra.mxu0 %v1139_v4  ;;  %v1153_v15 = vsub.f32 %v60_v1, %v1139_v4  ;;  %v1156_v16 = vsub.f32 %v59_v2, %v1141_v5  ;;  %v1158_v17 = vand.u32 4294901760, %v54_v13  ;;  %v52_v19 = vld [vmem:[#allocation5 + $0x38] sm:$0xff]  ;;  %v51_v26 = vld [vmem:[#allocation5 + $0x30] sm:$0xff]  ;;  %v50_v36 = vld [vmem:[#allocation5 + $0x28] sm:$0xff]  ;;  %s710_s1 = sshll.u32 %s1111_s0, 4  ;;  %s711_s1 = int_to_ptr.vmem [resolvable:$true] %s710_s1 }
  0x1e   :  { %v1161_v18 = vsub.f32 %v58_v3, %v1143_v6  ;;  %824 = vmatprep.subr.mxu0 %v1109_v0  ;;  %v1165_v20 = vsub.f32 %v57_v7, %v1145_v10  ;;  %v1168_v21 = vsub.f32 %v56_v8, %v1147_v11  ;;  %v1174_v25 = vand.u32 4294901760, %v53_v14  ;;  %v49_v41 = vld [vmem:[#allocation5 + $0x20] sm:$0xff]  ;;  %v48_v49 = vld [vmem:[#allocation5 + $0x18] sm:$0xff]  ;;  %v47_v54 = vld [vmem:[#allocation5 + $0x10] sm:$0xff]  ;;  %s1079_s21 = scalar_lea.vmem %s711_s1, 128  ;;  %p1084_p11 = scmp.lt.s32.totalorder %s711_s1, %s711_s1 }
  0x1f   :  { %825 = vmatpush3.msra.mxu0 %v1141_v5  ;;  %v155_v22 = vand.u32 4294901760, %v1153_v15  ;;  %v162_v23 = vand.u32 4294901760, %v1156_v16  ;;  %v1178_v28 = vand.u32 4294901760, %v52_v19  ;;  %v1182_v30 = vsub.f32 %v55_v9, %v1149_v12  ;;  %v44_v50 = vld [vmem:[#allocation2] sm:$0xff]  ;;  %v46_v60 = vld [vmem:[#allocation5 + $0x8] sm:$0xff]  ;;  %v45_v7 = vld [vmem:[#allocation5] sm:$0xff]  ;;  %p1080_p10 = scmp.ne.s32.totalorder %s711_s1, %s1079_s21  ;;  %p1085_p12 = scmp.lt.s32.totalorder %s1079_s21, %s1079_s21 }
  0x20   :  { %v169_v24 = vand.u32 4294901760, %v1161_v18  ;;  %826 = vmatprep.subr.mxu0 %v1109_v0  ;;  %v176_v27 = vand.u32 4294901760, %v1165_v20  ;;  %v183_v29 = vand.u32 4294901760, %v1168_v21  ;;  %v1195_v34 = vsub.f32 %v54_v13, %v1158_v17 }
  0x21   :  { %827 = vmatpush3.msra.mxu0 %v1143_v6  ;;  %v156_v31 = vsub.f32 %v1153_v15, %v155_v22  ;;  %v163_v32 = vsub.f32 %v1156_v16, %v162_v23  ;;  %v1198_v35 = vand.u32 4294901760, %v51_v26  ;;  %v190_v40 = vand.u32 4294901760, %v1182_v30  ;;  %p1086_p13 = por %p1085_p12, %p1084_p11 }
  0x22   :  { %v170_v33 = vsub.f32 %v1161_v18, %v169_v24  ;;  %828 = vmatprep.subr.mxu0 %v1109_v0  ;;  %v177_v39 = vsub.f32 %v1165_v20, %v176_v27  ;;  %v184_v42 = vsub.f32 %v1168_v21, %v183_v29  ;;  %v1210_v43 = vsub.f32 %v53_v14, %v1174_v25 }
  0x23   :  { %829 = vmatpush3.msra.mxu0 %v1145_v10  ;;  %v157_v37 = vand.u32 4294901760, %v156_v31  ;;  %v164_v38 = vand.u32 4294901760, %v163_v32  ;;  %v1213_v45 = vand.u32 4294901760, %v50_v36  ;;  %v197_v46 = vand.u32 4294901760, %v1195_v34  ;;  %p1087_p0 = pnand %p1086_p13, %p1080_p10 }
  0x24   :  { %830 = vmatprep.subr.mxu0 %v1109_v0  ;;  %v171_v44 = vand.u32 4294901760, %v170_v33  ;;  %v1217_v47 = vsub.f32 %v52_v19, %v1178_v28  ;;  %v1221_v48 = vand.u32 4294901760, %v49_v41  ;;  %v178_v51 = vand.u32 4294901760, %v177_v39 }
  0x25   :  { %831 = vmatpush3.msra.mxu0 %v1147_v11  ;;  %858 = vmatpush3.msra.mxu1 %v157_v37  ;;  %v191_v52 = vsub.f32 %v1182_v30, %v190_v40  ;;  %v204_v53 = vand.u32 4294901760, %v1210_v43  ;;  %v1229_v55 = vsub.f32 %v51_v26, %v1198_v35  ;;  %v185_v56 = vand.u32 4294901760, %v184_v42 }
  0x26   :  { %832 = vmatprep.subr.mxu0 %v1109_v0  ;;  %859 = vmatprep.subr.mxu1 %v1109_v0  ;;  %v211_v57 = vand.u32 4294901760, %v1217_v47  ;;  %v198_v58 = vsub.f32 %v1195_v34, %v197_v46  ;;  %v1238_v59 = vand.u32 4294901760, %v48_v49  ;;  %v1241_v61 = vsub.f32 %v50_v36, %v1213_v45 }
  0x27   :  { %833 = vmatpush3.msra.mxu0 %v1149_v12  ;;  %860 = vmatpush3.msra.mxu1 %v164_v38  ;;  %v1243_v62 = vand.u32 4294901760, %v44_v50  ;;  %v1247_v63 = vand.u32 4294901760, %v47_v54  ;;  %v192_v1 = vand.u32 4294901760, %v191_v52  ;;  %v205_v2 = vsub.f32 %v1210_v43, %v204_v53 }
  0x28   :  { %834 = vmatprep.subr.mxu0 %v1109_v0  ;;  %861 = vmatprep.subr.mxu1 %v1109_v0  ;;  %v218_v3 = vand.u32 4294901760, %v1229_v55  ;;  %v1255_v8 = vsub.f32 %v49_v41, %v1221_v48  ;;  %v212_v9 = vsub.f32 %v1217_v47, %v211_v57  ;;  %v1262_v13 = vand.u32 4294901760, %v46_v60 }
  0x29   :  { %835 = vmatpush3.msra.mxu0 %v1158_v17  ;;  %862 = vmatpush3.msra.mxu1 %v171_v44  ;;  %v199_v14 = vand.u32 4294901760, %v198_v58  ;;  %v225_v19 = vand.u32 4294901760, %v1241_v61  ;;  %v1267_v26 = vsub.f32 %v44_v50, %v1243_v62  ;;  %v1270_v31 = vsub.f32 %v48_v49, %v1238_v59 }
  0x2a   :  { %836 = vmatprep.subr.mxu0 %v1109_v0  ;;  %863 = vmatprep.subr.mxu1 %v1109_v0  ;;  %v1274_v32 = vand.u32 4294901760, %v45_v7  ;;  %v206_v33 = vand.u32 4294901760, %v205_v2  ;;  %v219_v36 = vsub.f32 %v1229_v55, %v218_v3  ;;  %v232_v37 = vand.u32 4294901760, %v1255_v8 }
  0x2b   :  { %837 = vmatpush3.msra.mxu0 %v1174_v25  ;;  %864 = vmatpush3.msra.mxu1 %v178_v51  ;;  %v1282_v38 = vsub.f32 %v47_v54, %v1247_v63  ;;  %v213_v39 = vand.u32 4294901760, %v212_v9  ;;  %v226_v41 = vsub.f32 %v1241_v61, %v225_v19  ;;  %v144_v42 = vand.u32 4294901760, %v1267_v26 }
  0x2c   :  { %838 = vmatprep.subr.mxu0 %v1109_v0  ;;  %865 = vmatprep.subr.mxu1 %v1109_v0  ;;  %v239_v44 = vand.u32 4294901760, %v1270_v31  ;;  %v1293_v49 = vsub.f32 %v46_v60, %v1262_v13  ;;  %v220_v50 = vand.u32 4294901760, %v219_v36  ;;  %v233_v51 = vsub.f32 %v1255_v8, %v232_v37 }
  0x2d   :  { %839 = vmatpush3.msra.mxu0 %v1178_v28  ;;  %866 = vmatpush3.msra.mxu1 %v185_v56  ;;  %v246_v52 = vand.u32 4294901760, %v1282_v38  ;;  %v1303_v54 = vsub.f32 %v45_v7, %v1274_v32  ;;  %v227_v56 = vand.u32 4294901760, %v226_v41  ;;  %v145_v58 = vsub.f32 %v1267_v26, %v144_v42 }
  0x2e   :  { %840 = vmatprep.subr.mxu0 %v1109_v0  ;;  %867 = vmatprep.subr.mxu1 %v1109_v0  ;;  %v240_v60 = vsub.f32 %v1270_v31, %v239_v44  ;;  %v234_v2 = vand.u32 4294901760, %v233_v51 }
  0x2f   :  { %841 = vmatpush3.msra.mxu0 %v1198_v35  ;;  %868 = vmatpush3.msra.mxu1 %v192_v1  ;;  %v253_v1 = vand.u32 4294901760, %v1293_v49  ;;  %v247_v7 = vsub.f32 %v1282_v38, %v246_v52  ;;  %v260_v9 = vand.u32 4294901760, %v1303_v54 }
  0x30   :  { %842 = vmatprep.subr.mxu0 %v1109_v0  ;;  %869 = vmatprep.subr.mxu1 %v1109_v0 }
  0x31   :  { %843 = vmatpush3.msra.mxu0 %v1213_v45  ;;  %870 = vmatpush3.msra.mxu1 %v199_v14  ;;  %v146_v14 = vand.u32 4294901760, %v145_v58  ;;  %v254_v36 = vsub.f32 %v1293_v49, %v253_v1  ;;  %v261_v41 = vsub.f32 %v1303_v54, %v260_v9 }
  0x32   :  { %844 = vmatprep.subr.mxu0 %v1109_v0  ;;  %871 = vmatprep.subr.mxu1 %v1109_v0 }
  0x33   :  { %845 = vmatpush3.msra.mxu0 %v1221_v48  ;;  %872 = vmatpush3.msra.mxu1 %v206_v33  ;;  %v241_v33 = vand.u32 4294901760, %v240_v60  ;;  %v262_v51 = vand.u32 4294901760, %v261_v41 }
  0x34   :  { %846 = vmatprep.subr.mxu0 %v1109_v0  ;;  %873 = vmatprep.subr.mxu1 %v1109_v0 }
  0x35   :  { %847 = vmatpush3.msra.mxu0 %v1238_v59  ;;  %874 = vmatpush3.msra.mxu1 %v213_v39  ;;  %v248_v39 = vand.u32 4294901760, %v247_v7 }
  0x36   :  { %848 = vmatprep.subr.mxu0 %v1109_v0  ;;  %875 = vmatprep.subr.mxu1 %v1109_v0 }
  0x37   :  { %849 = vmatpush3.msra.mxu0 %v1247_v63  ;;  %876 = vmatpush3.msra.mxu1 %v220_v50  ;;  %v255_v50 = vand.u32 4294901760, %v254_v36 }
  0x38   :  { %850 = vmatprep.subr.mxu0 %v1109_v0  ;;  %877 = vmatprep.subr.mxu1 %v1109_v0 }
  0x39   :  { %851 = vmatpush3.msra.mxu0 %v1262_v13  ;;  %878 = vmatpush3.msra.mxu1 %v227_v56 }
  0x3a   :  { %852 = vmatprep.subr.mxu0 %v1109_v0  ;;  %879 = vmatprep.subr.mxu1 %v1109_v0 }
  0x3b   :  { %853 = vmatpush3.msra.mxu0 %v1274_v32  ;;  %880 = vmatpush3.msra.mxu1 %v234_v2 }
  0x3c   :  { %881 = vmatprep.subr.mxu1 %v1109_v0  ;;  %892 = vmatprep.subr.mxu0 %v1109_v0 }
  0x3d   :  { %855 = vmatmul.mubr.f32.vlgmr.msra.gmra.mxu0 %v146_v14  ;;  %882 = vmatpush3.msra.mxu1 %v241_v33 }
  0x3e   :  { %893 = vmatpush3.msra.mxu0 %v1153_v15  ;;  %883 = vmatprep.subr.mxu1 %v1109_v0 }
  0x3f   :  { %894 = vmatprep.subr.mxu0 %v1109_v0  ;;  %884 = vmatpush3.msra.mxu1 %v248_v39 }
  0x40   :  { %895 = vmatpush3.msra.mxu0 %v1156_v16  ;;  %885 = vmatprep.subr.mxu1 %v1109_v0 }
  0x41   :  { %896 = vmatprep.subr.mxu0 %v1109_v0  ;;  %886 = vmatpush3.msra.mxu1 %v255_v50 }
  0x42   :  { %897 = vmatpush3.msra.mxu0 %v1161_v18  ;;  %887 = vmatprep.subr.mxu1 %v1109_v0 }
  0x43   :  { %898 = vmatprep.subr.mxu0 %v1109_v0  ;;  %888 = vmatpush3.msra.mxu1 %v262_v51 }
  0x44   :  { %899 = vmatpush3.msra.mxu0 %v1165_v20  ;;  %890 = vmatmul.mubr.f32.vlgmr.msra.gmra.mxu1 %v1243_v62 }
  0x45   :  { %900 = vmatprep.subr.mxu0 %v1109_v0  ;;  %927 = vmatprep.subr.mxu1 %v1109_v0 }
  0x46   :  { %901 = vmatpush3.msra.mxu0 %v1168_v21  ;;  %928 = vmatpush3.msra.mxu1 %v1139_v4 }
  0x47   :  { %902 = vmatprep.subr.mxu0 %v1109_v0  ;;  %929 = vmatprep.subr.mxu1 %v1109_v0 }
  0x48   :  { %903 = vmatpush3.msra.mxu0 %v1182_v30  ;;  %930 = vmatpush3.msra.mxu1 %v1141_v5 }
  0x49   :  { %904 = vmatprep.subr.mxu0 %v1109_v0  ;;  %931 = vmatprep.subr.mxu1 %v1109_v0 }
  0x4a   :  { %905 = vmatpush3.msra.mxu0 %v1195_v34  ;;  %932 = vmatpush3.msra.mxu1 %v1143_v6 }
  0x4b   :  { %906 = vmatprep.subr.mxu0 %v1109_v0  ;;  %933 = vmatprep.subr.mxu1 %v1109_v0 }
  0x4c   :  { %907 = vmatpush3.msra.mxu0 %v1210_v43  ;;  %934 = vmatpush3.msra.mxu1 %v1145_v10 }
  0x4d   :  { %908 = vmatprep.subr.mxu0 %v1109_v0  ;;  %935 = vmatprep.subr.mxu1 %v1109_v0 }
  0x4e   :  { %909 = vmatpush3.msra.mxu0 %v1217_v47  ;;  %936 = vmatpush3.msra.mxu1 %v1147_v11 }
  0x4f   :  { %910 = vmatprep.subr.mxu0 %v1109_v0  ;;  %937 = vmatprep.subr.mxu1 %v1109_v0 }
  0x50   :  { %911 = vmatpush3.msra.mxu0 %v1229_v55  ;;  %938 = vmatpush3.msra.mxu1 %v1149_v12 }
  0x51   :  { %912 = vmatprep.subr.mxu0 %v1109_v0  ;;  %939 = vmatprep.subr.mxu1 %v1109_v0 }
  0x52   :  { %913 = vmatpush3.msra.mxu0 %v1241_v61  ;;  %940 = vmatpush3.msra.mxu1 %v1158_v17 }
  0x53   :  { %914 = vmatprep.subr.mxu0 %v1109_v0  ;;  %941 = vmatprep.subr.mxu1 %v1109_v0 }
  0x54   :  { %915 = vmatpush3.msra.mxu0 %v1255_v8  ;;  %942 = vmatpush3.msra.mxu1 %v1174_v25 }
  0x55   :  { %916 = vmatprep.subr.mxu0 %v1109_v0  ;;  %943 = vmatprep.subr.mxu1 %v1109_v0 }
  0x56   :  { %917 = vmatpush3.msra.mxu0 %v1270_v31  ;;  %944 = vmatpush3.msra.mxu1 %v1178_v28 }
  0x57   :  { %918 = vmatprep.subr.mxu0 %v1109_v0  ;;  %945 = vmatprep.subr.mxu1 %v1109_v0 }
  0x58   :  { %919 = vmatpush3.msra.mxu0 %v1282_v38  ;;  %946 = vmatpush3.msra.mxu1 %v1198_v35 }
  0x59   :  { %920 = vmatprep.subr.mxu0 %v1109_v0  ;;  %947 = vmatprep.subr.mxu1 %v1109_v0 }
  0x5a   :  { %921 = vmatpush3.msra.mxu0 %v1293_v49  ;;  %948 = vmatpush3.msra.mxu1 %v1213_v45 }
  0x5b   :  { %922 = vmatprep.subr.mxu0 %v1109_v0  ;;  %949 = vmatprep.subr.mxu1 %v1109_v0 }
  0x5c   :  { %923 = vmatpush3.msra.mxu0 %v1303_v54  ;;  %924 = vmatprep.mubr.msk.f32.mxu0 %vm1110_vm0, %v1109_v0 }
  0x5d   :  { %950 = vmatpush3.msra.mxu1 %v1221_v48  ;;  %925 = vmatmul.mubr.f32.vlgmr.msra.gmra.mxu0 %v1267_v26 }
  0x5e   :  { %951 = vmatprep.subr.mxu1 %v1109_v0  ;;  %962 = vmatprep.subr.mxu0 %v1109_v0 }
  0x5f   :  { %952 = vmatpush3.msra.mxu1 %v1238_v59  ;;  %963 = vmatpush3.msra.mxu0 %v155_v22 }
  0x60   :  { %953 = vmatprep.subr.mxu1 %v1109_v0  ;;  %964 = vmatprep.subr.mxu0 %v1109_v0 }
  0x61   :  { %954 = vmatpush3.msra.mxu1 %v1247_v63  ;;  %965 = vmatpush3.msra.mxu0 %v162_v23 }
  0x62   :  { %955 = vmatprep.subr.mxu1 %v1109_v0  ;;  %966 = vmatprep.subr.mxu0 %v1109_v0 }
  0x63   :  { %956 = vmatpush3.msra.mxu1 %v1262_v13  ;;  %967 = vmatpush3.msra.mxu0 %v169_v24 }
  0x64   :  { %957 = vmatprep.subr.mxu1 %v1109_v0  ;;  %968 = vmatprep.subr.mxu0 %v1109_v0 }
  0x65   :  { %958 = vmatpush3.msra.mxu1 %v1274_v32  ;;  %959 = vmatprep.mubr.msk.f32.mxu1 %vm1110_vm0, %v1109_v0 }
  0x66   :  { %969 = vmatpush3.msra.mxu0 %v176_v27  ;;  %960 = vmatmul.mubr.f32.vlgmr.msra.gmra.mxu1 %v144_v42 }
  0x67   :  { %970 = vmatprep.subr.mxu0 %v1109_v0  ;;  %997 = vmatprep.subr.mxu1 %v1109_v0 }
  0x68   :  { %971 = vmatpush3.msra.mxu0 %v183_v29  ;;  %998 = vmatpush3.msra.mxu1 %v1139_v4 }
  0x69   :  { %972 = vmatprep.subr.mxu0 %v1109_v0  ;;  %999 = vmatprep.subr.mxu1 %v1109_v0 }
  0x6a   :  { %973 = vmatpush3.msra.mxu0 %v190_v40  ;;  %1000 = vmatpush3.msra.mxu1 %v1141_v5 }
  0x6b   :  { %974 = vmatprep.subr.mxu0 %v1109_v0  ;;  %1001 = vmatprep.subr.mxu1 %v1109_v0 }
  0x6c   :  { %975 = vmatpush3.msra.mxu0 %v197_v46  ;;  %1002 = vmatpush3.msra.mxu1 %v1143_v6 }
  0x6d   :  { %976 = vmatprep.subr.mxu0 %v1109_v0  ;;  %1003 = vmatprep.subr.mxu1 %v1109_v0 }
  0x6e   :  { %977 = vmatpush3.msra.mxu0 %v204_v53  ;;  %1004 = vmatpush3.msra.mxu1 %v1145_v10 }
  0x6f   :  { %978 = vmatprep.subr.mxu0 %v1109_v0  ;;  %1005 = vmatprep.subr.mxu1 %v1109_v0 }
  0x70   :  { %979 = vmatpush3.msra.mxu0 %v211_v57  ;;  %1006 = vmatpush3.msra.mxu1 %v1147_v11 }
  0x71   :  { %980 = vmatprep.subr.mxu0 %v1109_v0  ;;  %1007 = vmatprep.subr.mxu1 %v1109_v0 }
  0x72   :  { %981 = vmatpush3.msra.mxu0 %v218_v3  ;;  %1008 = vmatpush3.msra.mxu1 %v1149_v12 }
  0x73   :  { %982 = vmatprep.subr.mxu0 %v1109_v0  ;;  %1009 = vmatprep.subr.mxu1 %v1109_v0 }
  0x74   :  { %983 = vmatpush3.msra.mxu0 %v225_v19  ;;  %1010 = vmatpush3.msra.mxu1 %v1158_v17 }
  0x75   :  { %984 = vmatprep.subr.mxu0 %v1109_v0  ;;  %1011 = vmatprep.subr.mxu1 %v1109_v0 }
  0x76   :  { %985 = vmatpush3.msra.mxu0 %v232_v37  ;;  %1012 = vmatpush3.msra.mxu1 %v1174_v25 }
  0x77   :  { %986 = vmatprep.subr.mxu0 %v1109_v0  ;;  %1013 = vmatprep.subr.mxu1 %v1109_v0 }
  0x78   :  { %987 = vmatpush3.msra.mxu0 %v239_v44  ;;  %1014 = vmatpush3.msra.mxu1 %v1178_v28 }
  0x79   :  { %988 = vmatprep.subr.mxu0 %v1109_v0  ;;  %1015 = vmatprep.subr.mxu1 %v1109_v0 }
  0x7a   :  { %989 = vmatpush3.msra.mxu0 %v246_v52  ;;  %1016 = vmatpush3.msra.mxu1 %v1198_v35 }
  0x7b   :  { %990 = vmatprep.subr.mxu0 %v1109_v0  ;;  %1017 = vmatprep.subr.mxu1 %v1109_v0 }
  0x7c   :  { %991 = vmatpush3.msra.mxu0 %v253_v1  ;;  %1018 = vmatpush3.msra.mxu1 %v1213_v45 }
  0x7d   :  { %992 = vmatprep.subr.mxu0 %v1109_v0  ;;  %1019 = vmatprep.subr.mxu1 %v1109_v0 }
  0x7e   :  { %993 = vmatpush3.msra.mxu0 %v260_v9  ;;  %994 = vmatprep.mubr.msk.f32.mxu0 %vm1110_vm0, %v1109_v0 }
  0x7f   :  { %1020 = vmatpush3.msra.mxu1 %v1221_v48  ;;  %995 = vmatmul.mubr.f32.vlgmr.msra.gmra.mxu0 %v1243_v62 }
  0x80   :  { %1021 = vmatprep.subr.mxu1 %v1109_v0  ;;  %1029 = vmatprep.mubr.msk.f32.mxu1 %vm1110_vm0, %v1109_v0 }
  0x81   :  { %1022 = vmatpush3.msra.mxu1 %v1238_v59 }
  0x82   :  { %1023 = vmatprep.subr.mxu1 %v1109_v0 }
  0x83   :  { %1024 = vmatpush3.msra.mxu1 %v1247_v63 }
  0x84   :  { %1025 = vmatprep.subr.mxu1 %v1109_v0 }
  0x85   :  { %1026 = vmatpush3.msra.mxu1 %v1262_v13 }
  0x86   :  { %1027 = vmatprep.subr.mxu1 %v1109_v0 }
  0x87   :  { %1028 = vmatpush3.msra.mxu1 %v1274_v32 }
  0x88   :  { %1030 = vmatmul.mubr.f32.vlgmr.msra.gmra.mxu1 %v1243_v62 }
  0xfd   :  { %v148_v4 = vpop.f32.mrf.mxu0 }
  0xff   :  { %v856_v5 = vpop.f32.mrf.mxu0 }
 0x104   :  { %v299_v6 = vpop.f32.mrf.mxu1 }
 0x105   :  { %v300_v18 = vadd.f32 %v299_v6, %v148_v4 }
 0x106   :  { %v891_v10 = vpop.f32.mrf.mxu1 }
 0x11d   :  { %v403_v11 = vpop.f32.mrf.mxu0 }
 0x11e   :  { %v404_v21 = vadd.f32 %v403_v11, %v300_v18 }
 0x11f   :  { %v926_v12 = vpop.f32.mrf.mxu0 }
 0x126   :  { %v492_v15 = vpop.f32.mrf.mxu1 }
 0x127   :  { %v493_v22 = vadd.f32 %v492_v15, %v404_v21 }
 0x128   :  { %v961_v16 = vpop.f32.mrf.mxu1 }
 0x13f   :  { %v611_v17 = vpop.f32.mrf.mxu0 }
 0x140   :  { %v612_v23 = vadd.f32 %v611_v17, %v493_v22 }
 0x141   :  { %v996_v20 = vpop.f32.mrf.mxu0 }
 0x148   :  { %v698_v24 = vpop.f32.mrf.mxu1 }
 0x149   :  { %v699_v0 = vadd.f32 %v698_v24, %v612_v23 }
 0x14a   :  { %v1031_v25 = vpop.f32.mrf.mxu1 }
 0x14b   :  { %703 = vst [vmem:[#allocation7] sm:$0xff] %v699_v0 }
 0x14c   :  { %1090 = shalt.err (!%p1087_p0)
}
 0x14d   :  { %713 = dma.vmem_to_hbm [thread:$0]  %s711_s1, 128, %s1501_s2, [#allocation4]  }
 0x14e   :  { %1103 = dma.done.wait [#allocation4], 128  }
 0x14f   :  { %1104 = vsyncadd [#allocation4], 4294967168 }
 0x150   :  { %717 = vsyncpa [#allocation3], 1 }
 0x151   :  { %718 = vsyncpa [#allocation6], 1 }
 0x152   :  { %719 = vsyncpa [#allocation4], 1 }

</bundles_post_ra>
